<compile_context>
chip_gen: v6e
topology: v6e:2x2x1
jax: 0.10.0
libtpu: 0.0.40
codegen_flags: <defaults>
</compile_context>

<pallas_src>
import functools

import jax
import jax.numpy as jnp
from jax.experimental import pallas as pl
from jax.experimental.pallas import tpu as pltpu

_EPS = 1e-5  # BatchNorm1d default


def _round_up(v, m):
    return (v + m - 1) // m * m


def _vmem_limit_bytes():
    """Generation-aware VMEM budget with headroom (64 MiB/TC v7x, 128 MiB v5e/v6e)."""
    try:
        cap = int(pltpu.get_tpu_info().vmem_capacity_bytes)
    except Exception:
        cap = 64 << 20
    return int(min(max(cap - (24 << 20), 24 << 20), 96 << 20))


def _tile_rows(n_rows, n_cols, itemsize, vmem_limit, max_tile_rows):
    """Row-tile size: multi-MiB blocks, packing-aligned, double-buffer friendly."""
    sub = max(8, 32 // itemsize)          # sublane packing: f32->8, bf16->16, int8->32
    lanes = _round_up(n_cols, 128)
    # Phase-2 live set ~ 2x(x tile) + 2x(out tile) + resident scale/shift.
    per_buf = min(4 << 20, vmem_limit // 8)
    tm = per_buf // (lanes * itemsize)
    tm = min(tm, max_tile_rows, n_rows)
    tm = max(sub, tm // sub * sub)
    return tm


def _stats_kernel(x_ref, part_ref, sum_sc, sq_sc, *,
                  n_rows, tile_rows, tiles_per_split):
    """Per-split raw stats: sum(x) and sum(x*x) over this split's row tiles."""
    s = pl.program_id(0)
    t = pl.program_id(1)

    @pl.when(t == 0)
    def _init():
        sum_sc[...] = jnp.zeros_like(sum_sc)
        sq_sc[...] = jnp.zeros_like(sq_sc)

    # Mask rows past the end of the array: the last tile may be ragged, and a
    # fully out-of-range tile index is clamped by the index_map; OOB rows of a
    # partial input block are not guaranteed to be zero on TPU.
    start = (s * tiles_per_split + t) * tile_rows
    rows_left = n_rows - start
    row_ids = jax.lax.broadcasted_iota(jnp.int32, x_ref.shape, 0)
    x = x_ref[...].astype(jnp.float32)
    x = jnp.where(row_ids < rows_left, x, 0.0)

    # Keep per-step accumulation at sublane granularity (pure VPU adds); the
    # 8 -> 1 cross-sublane reduce happens once per split in the finalize.
    xr = x.reshape(tile_rows // 8, 8, x.shape[-1])
    sum_sc[...] += jnp.sum(xr, axis=0)
    sq_sc[...] += jnp.sum(xr * xr, axis=0)

    @pl.when(t == pl.num_programs(1) - 1)
    def _finalize():
        psum = jnp.sum(sum_sc[...], axis=0, keepdims=True)   # (1, C)
        psq = jnp.sum(sq_sc[...], axis=0, keepdims=True)     # (1, C)
        part_ref[...] = jnp.concatenate([psum, psq], axis=0)[None]  # (1, 2, C)


def _apply_kernel(scale_ref, shift_ref, x_ref, o_ref):
    """y = x * scale + shift  (BN + alpha*x folded into a per-channel affine)."""
    x = x_ref[...].astype(jnp.float32)
    o_ref[...] = (x * scale_ref[...] + shift_ref[...]).astype(o_ref.dtype)


def _fused_kernel(x_ref, gamma_ref, beta_ref, alpha_ref, o_ref, *, n_rows):
    """Single-block fast path for small inputs: stats + apply, one HBM read of x."""
    x = x_ref[...].astype(jnp.float32)
    inv_n = jnp.float32(1.0 / n_rows)
    mean = jnp.sum(x, axis=0, keepdims=True) * inv_n
    var = jnp.maximum(jnp.sum(x * x, axis=0, keepdims=True) * inv_n - mean * mean,
                      0.0)
    inv_std = jax.lax.rsqrt(var + jnp.float32(_EPS))
    g = gamma_ref[...].astype(jnp.float32) * inv_std
    scale = g + alpha_ref[0, 0]
    shift = beta_ref[...].astype(jnp.float32) - mean * g
    o_ref[...] = (x * scale + shift).astype(o_ref.dtype)


def repbn_forward(x, alpha, gamma, beta, *, max_tile_rows=8192,
                  force_two_pass=False):
    """RepBN forward. x: (B, T, C); alpha: (1,); gamma/beta: (C,)."""
    B, T, C = x.shape
    N = B * T
    x2d = x.reshape(N, C)
    itemsize = jnp.dtype(x.dtype).itemsize
    sub = max(8, 32 // itemsize)
    vmem_limit = _vmem_limit_bytes()

    # ---- Fused single-block fast path: x read from HBM exactly once. ----
    fused_f32_bytes = _round_up(N, 8) * _round_up(C, 128) * 4
    small = fused_f32_bytes * 6 <= min(vmem_limit, 24 << 20)
    if (small and not force_two_pass) or N < sub:
        out2d = pl.pallas_call(
            functools.partial(_fused_kernel, n_rows=N),
            out_shape=jax.ShapeDtypeStruct((N, C), x.dtype),
            grid=(1,),
            in_specs=[
                pl.BlockSpec((N, C), lambda i: (0, 0)),
                pl.BlockSpec((1, C), lambda i: (0, 0)),
                pl.BlockSpec((1, C), lambda i: (0, 0)),
                pl.BlockSpec((1, 1), lambda i: (0, 0)),
            ],
            out_specs=pl.BlockSpec((N, C), lambda i: (0, 0)),
            compiler_params=pltpu.CompilerParams(
                dimension_semantics=("arbitrary",),
                vmem_limit_bytes=vmem_limit),
        )(x2d, gamma.reshape(1, C), beta.reshape(1, C),
          alpha.reshape(1, 1).astype(jnp.float32))
        return out2d.reshape(B, T, C)

    # ---- Two-pass streaming path. ----
    TM = _tile_rows(N, C, itemsize, vmem_limit, max_tile_rows)
    num_tiles = pl.cdiv(N, TM)
    num_splits = 2 if num_tiles >= 2 else 1        # v7x: one split per TensorCore
    tiles_per_split = pl.cdiv(num_tiles, num_splits)

    def stats_x_map(s, t):
        idx = s * tiles_per_split + t
        if num_splits * tiles_per_split > num_tiles:
            idx = jnp.minimum(idx, num_tiles - 1)  # clamp the overshoot tile
        return (idx, 0)

    # Phase 1: per-split raw (sum, sumsq) partials, leading axis parallel.
    partials = pl.pallas_call(
        functools.partial(_stats_kernel, n_rows=N, tile_rows=TM,
                          tiles_per_split=tiles_per_split),
        out_shape=jax.ShapeDtypeStruct((num_splits, 2, C), jnp.float32),
        grid=(num_splits, tiles_per_split),
        in_specs=[pl.BlockSpec((TM, C), stats_x_map)],
        out_specs=pl.BlockSpec((1, 2, C), lambda s, t: (s, 0, 0)),
        scratch_shapes=[pltpu.VMEM((8, C), jnp.float32),
                        pltpu.VMEM((8, C), jnp.float32)],
        compiler_params=pltpu.CompilerParams(
            dimension_semantics=("parallel", "arbitrary"),
            vmem_limit_bytes=vmem_limit),
    )(x2d)

    # Tiny finalize on (C,) vectors: fold BN + alpha into (scale, shift).
    # Note: variance uses E[x^2] - E[x]^2 with f32 accumulation; fine for
    # roughly-centered activations (chunk-centered partials would be needed
    # for inputs with very large mean).
    inv_n = jnp.float32(1.0) / jnp.float32(N)
    mean = jnp.sum(partials[:, 0, :], axis=0) * inv_n
    var = jnp.maximum(jnp.sum(partials[:, 1, :], axis=0) * inv_n - mean * mean, 0.0)
    inv_std = jax.lax.rsqrt(var + jnp.float32(_EPS))
    g = gamma.astype(jnp.float32) * inv_std
    scale = (g + alpha.astype(jnp.float32)[0]).reshape(1, C)
    shift = (beta.astype(jnp.float32) - mean * g).reshape(1, C)

    # Phase 2: streamed y = x*scale + shift; tiles shard across TCs (v7x).
    out2d = pl.pallas_call(
        _apply_kernel,
        out_shape=jax.ShapeDtypeStruct((N, C), x.dtype),
        grid=(num_tiles,),
        in_specs=[
            pl.BlockSpec((1, C), lambda i: (0, 0)),   # scale (resident)
            pl.BlockSpec((1, C), lambda i: (0, 0)),   # shift (resident)
            pl.BlockSpec((TM, C), lambda i: (i, 0)),  # x row tile
        ],
        out_specs=pl.BlockSpec((TM, C), lambda i: (i, 0)),
        compiler_params=pltpu.CompilerParams(
            dimension_semantics=("parallel",),
            vmem_limit_bytes=vmem_limit),
    )(scale, shift, x2d)

    return out2d.reshape(B, T, C)


def _reference(x, alpha, gamma, beta):
    x32 = x.astype(jnp.float32)
    mean = jnp.mean(x32, axis=(0, 1), keepdims=True)
    var = jnp.mean((x32 - mean) ** 2, axis=(0, 1), keepdims=True)
    y = gamma * (x32 - mean) * jax.lax.rsqrt(var + _EPS) + beta + alpha[0] * x32
    return y.astype(x.dtype)


if __name__ == "__main__":
    # Case 1: module-default init (alpha=1, gamma=1, beta=0), small shape.
    # Takes the fused single-pass path.
    B, T, C = 2, 8, 32
    x = jax.random.normal(jax.random.PRNGKey(0), (B, T, C), dtype=jnp.float32)
    alpha = jnp.ones((1,), dtype=jnp.float32)   # nn.Parameter(torch.ones(1))
    gamma = jnp.ones((C,), dtype=jnp.float32)   # BatchNorm1d weight
    beta = jnp.zeros((C,), dtype=jnp.float32)   # BatchNorm1d bias

    out = jax.block_until_ready(repbn_forward(x, alpha, gamma, beta))
    ref = _reference(x, alpha, gamma, beta)
    assert out.shape == (B, T, C)
    assert jnp.allclose(out, ref, atol=1e-4, rtol=1e-4), (
        float(jnp.max(jnp.abs(out - ref))))

    # Case 2: exercise the two-pass streaming path (multiple row tiles, ragged
    # last tile, odd tile count -> clamped overshoot tile, non-trivial params,
    # nonzero input mean, C not a multiple of 128 without any padding).
    B2, T2, C2 = 2, 497, 96
    k1, k2, k3, k4 = jax.random.split(jax.random.PRNGKey(0), 4)
    x2 = 2.0 * jax.random.normal(k1, (B2, T2, C2), dtype=jnp.float32) + 1.0
    alpha2 = 0.5 + jax.random.uniform(k2, (1,), dtype=jnp.float32)
    gamma2 = 0.5 + jax.random.uniform(k3, (C2,), dtype=jnp.float32)
    beta2 = jax.random.normal(k4, (C2,), dtype=jnp.float32)

    out2 = jax.block_until_ready(
        repbn_forward(x2, alpha2, gamma2, beta2,
                      force_two_pass=True, max_tile_rows=200))
    ref2 = _reference(x2, alpha2, gamma2, beta2)
    assert out2.shape == (B2, T2, C2)
    assert jnp.allclose(out2, ref2, atol=2e-4, rtol=2e-4), (
        float(jnp.max(jnp.abs(out2 - ref2))))

    print("KERNEL_OK")
</pallas_src>

<mosaic_0001>
module attributes {stable_mosaic.version = 11 : i64} {
  func.func @_fused_kernel(%arg0: i32, %arg1: memref<16x32xf32, #tpu.memory_space<vmem>>, %arg2: memref<1x32xf32, #tpu.memory_space<vmem>>, %arg3: memref<1x32xf32, #tpu.memory_space<vmem>>, %arg4: memref<1x1xf32, #tpu.memory_space<vmem>>, %arg5: memref<16x32xf32, #tpu.memory_space<vmem>>) attributes {dimension_semantics = [#tpu.dimension_semantics<arbitrary>], iteration_bounds = array<i64: 1>, scalar_prefetch = 0 : i64, scratch_operands = 0 : i64, tpu.core_type = #tpu.core_type<tc>, window_params = [{pipeline_mode = #tpu.pipeline_mode<synchronous>, transform_indices = @transform_0, window_bounds = array<i64: 16, 32>}, {pipeline_mode = #tpu.pipeline_mode<synchronous>, transform_indices = @transform_1, window_bounds = array<i64: 1, 32>}, {pipeline_mode = #tpu.pipeline_mode<synchronous>, transform_indices = @transform_2, window_bounds = array<i64: 1, 32>}, {pipeline_mode = #tpu.pipeline_mode<synchronous>, transform_indices = @transform_3, window_bounds = array<i64: 1, 1>}, {pipeline_mode = #tpu.pipeline_mode<synchronous>, transform_indices = @transform_4, window_bounds = array<i64: 16, 32>}]} {
    %c0 = arith.constant 0 : index
    %c0_0 = arith.constant 0 : index
    %0 = vector.load %arg1[%c0, %c0_0] : memref<16x32xf32, #tpu.memory_space<vmem>>, vector<16x32xf32>
    %cst = arith.constant dense<0.000000e+00> : vector<32xf32>
    %1 = vector.multi_reduction <add>, %0, %cst [0] : vector<16x32xf32> to vector<32xf32>
    %2 = vector.shape_cast %1 : vector<32xf32> to vector<1x32xf32>
    %cst_1 = arith.constant 6.250000e-02 : f32
    %3 = vector.broadcast %cst_1 : f32 to vector<1x32xf32>
    %4 = arith.mulf %2, %3 : vector<1x32xf32>
    %5 = arith.mulf %0, %0 : vector<16x32xf32>
    %cst_2 = arith.constant dense<0.000000e+00> : vector<32xf32>
    %6 = vector.multi_reduction <add>, %5, %cst_2 [0] : vector<16x32xf32> to vector<32xf32>
    %7 = vector.shape_cast %6 : vector<32xf32> to vector<1x32xf32>
    %cst_3 = arith.constant 6.250000e-02 : f32
    %8 = vector.broadcast %cst_3 : f32 to vector<1x32xf32>
    %9 = arith.mulf %7, %8 : vector<1x32xf32>
    %10 = arith.mulf %4, %4 : vector<1x32xf32>
    %11 = arith.subf %9, %10 : vector<1x32xf32>
    %cst_4 = arith.constant 0.000000e+00 : f32
    %12 = vector.broadcast %cst_4 : f32 to vector<1x32xf32>
    %13 = arith.maximumf %11, %12 : vector<1x32xf32>
    %cst_5 = arith.constant 9.99999974E-6 : f32
    %14 = vector.broadcast %cst_5 : f32 to vector<1x32xf32>
    %15 = arith.addf %13, %14 : vector<1x32xf32>
    %16 = math.rsqrt %15 : vector<1x32xf32>
    %c0_6 = arith.constant 0 : index
    %c0_7 = arith.constant 0 : index
    %17 = vector.load %arg2[%c0_6, %c0_7] : memref<1x32xf32, #tpu.memory_space<vmem>>, vector<1x32xf32>
    %18 = arith.mulf %17, %16 : vector<1x32xf32>
    %c0_8 = arith.constant 0 : index
    %c0_9 = arith.constant 0 : index
    %19 = vector.load %arg4[%c0_8, %c0_9] : memref<1x1xf32, #tpu.memory_space<vmem>>, vector<1x1xf32>
    %20 = vector.extract %19[0, 0] : f32 from vector<1x1xf32>
    %21 = vector.broadcast %20 : f32 to vector<1x32xf32>
    %22 = arith.addf %18, %21 : vector<1x32xf32>
    %c0_10 = arith.constant 0 : index
    %c0_11 = arith.constant 0 : index
    %23 = vector.load %arg3[%c0_10, %c0_11] : memref<1x32xf32, #tpu.memory_space<vmem>>, vector<1x32xf32>
    %24 = arith.mulf %4, %18 : vector<1x32xf32>
    %25 = arith.subf %23, %24 : vector<1x32xf32>
    %26 = vector.broadcast %22 : vector<1x32xf32> to vector<16x32xf32>
    %27 = arith.mulf %0, %26 : vector<16x32xf32>
    %28 = vector.broadcast %25 : vector<1x32xf32> to vector<16x32xf32>
    %29 = arith.addf %27, %28 : vector<16x32xf32>
    %c0_12 = arith.constant 0 : index
    %c0_13 = arith.constant 0 : index
    %30 = vector.load %arg5[%c0_12, %c0_13] : memref<16x32xf32, #tpu.memory_space<vmem>>, vector<16x32xf32>
    tpu.vector_store %arg5[%c0_12, %c0_13], %29 {strides = array<i32>} : memref<16x32xf32, #tpu.memory_space<vmem>>, vector<16x32xf32>,
    return
  }
  func.func @transform_0(%arg0: i32) -> (i32, i32) {
    %c0_i32 = arith.constant 0 : i32
    %c0_i32_0 = arith.constant 0 : i32
    %c0_i32_1 = arith.constant 0 : i32
    return %c0_i32, %c0_i32_0 : i32, i32
  }
  func.func @transform_1(%arg0: i32) -> (i32, i32) {
    %c0_i32 = arith.constant 0 : i32
    %c0_i32_0 = arith.constant 0 : i32
    %c0_i32_1 = arith.constant 0 : i32
    return %c0_i32, %c0_i32_0 : i32, i32
  }
  func.func @transform_2(%arg0: i32) -> (i32, i32) {
    %c0_i32 = arith.constant 0 : i32
    %c0_i32_0 = arith.constant 0 : i32
    %c0_i32_1 = arith.constant 0 : i32
    return %c0_i32, %c0_i32_0 : i32, i32
  }
  func.func @transform_3(%arg0: i32) -> (i32, i32) {
    %c0_i32 = arith.constant 0 : i32
    %c0_i32_0 = arith.constant 0 : i32
    %c0_i32_1 = arith.constant 0 : i32
    return %c0_i32, %c0_i32_0 : i32, i32
  }
  func.func @transform_4(%arg0: i32) -> (i32, i32) {
    %c0_i32 = arith.constant 0 : i32
    %c0_i32_0 = arith.constant 0 : i32
    %c0_i32_1 = arith.constant 0 : i32
    return %c0_i32, %c0_i32_0 : i32, i32
  }
}

</mosaic_0001>

<bundles_post_ra>
// kernel: tpu_custom_call.1
= control target key start
LH: loop header
LB: loop body
LE: loop exit
PB: predicated region body
PF: predicated region fallthrough
CT: control target
= control target key end

     0   :  { %s216_s0 = inlined_call_operand.hbm [shape: f32[16,32], index: 0, kind: input, shape index: {}]   ;;  %s217_s1 = inlined_call_operand.vmem [shape: f32[1,32], index: 1, kind: input, shape index: {}]   ;;  %s218_s2 = inlined_call_operand.vmem [shape: f32[1,32], index: 2, kind: input, shape index: {}]   ;;  %s219_s3 = inlined_call_operand.<no memory space> [shape: f32[1,1], index: 3, kind: input, shape index: {}]   ;;  %s220_s4 = inlined_call_operand.hbm [shape: f32[16,32], index: 4, kind: output, shape index: {}]  }
   0x1   :  { %v9_v0 = vstv %s219_s3 }
   0x2   :  { %10 = vst [vmem:[#allocation2] sm:$0x1] %v9_v0 }
   0x3   :  { %11 = vsyncpa [#allocation4], 0 }
   0x4   :  { %12 = vsyncpa [#allocation5], 0  ;;  %s160_s17 = smov [#allocation3]  }
   0x5   :  { %s18_s18 = sshll.u32 %s160_s17, 4  ;;  %s19_s18 = int_to_ptr.vmem [resolvable:$true] %s18_s18 }
   0x6   :  { %s124_s19 = scalar_lea.vmem %s19_s18, 256  ;;  %p129_p1 = scmp.lt.s32.totalorder %s19_s18, %s19_s18 }
   0x7   :  { %p125_p0 = scmp.ne.s32.totalorder %s19_s18, %s124_s19  ;;  %p130_p2 = scmp.lt.s32.totalorder %s124_s19, %s124_s19 }
   0x9   :  { %p131_p3 = por %p130_p2, %p129_p1 }
   0xb   :  { %p132_p4 = pnand %p131_p3, %p125_p0 }
   0xd   :  { %135 = shalt.err (!%p132_p4)
}
   0xe   :  { %s161_s20 = smov 128   ;;  %s162_s21 = smov 8  }
   0xf   :  { %24 = dma.hbm_to_vmem [thread:$0]  %s216_s0, 256, %s19_s18, [#allocation4], %s161_s20, %s161_s20, %s162_s21  }
  0x10   :  { %156 = dma.done.wait [#allocation4], 256  }
  0x11   :  { %157 = vsyncadd [#allocation4], 4294967040  ;;  %vm36_vm0 = vcmask 261120   ;;  %v66_v1 = vld [vmem:[#allocation2] sm:$0x1]  ;;  %v34_v2 = vld [vmem:[#allocation3] sm:$0xff]  ;;  %v74_v33 = vlaneseq }
  0x12   :  { %v35_v3 = vld [vmem:[#allocation3 + $0x8] sm:$0xff]  ;;  %108 = vpush %v66_v1  ;;  %v37_v4 = vsel %vm36_vm0, %v34_v2, 0.0  ;;  %v47_v6 = vmul.f32 %v34_v2, %v34_v2  ;;  %v64_v31 = vld [vmem:[%s217_s1] sm:$0x1]  ;;  %s163_s27 = smov [#allocation6]  }
  0x13   :  { %v38_v5 = vsel %vm36_vm0, %v35_v3, 0.0  ;;  %v48_v7 = vmul.f32 %v35_v3, %v35_v3  ;;  %v75_v35 = vshrl.u32 %v74_v33, 7  ;;  %v70_v36 = vld [vmem:[%s218_s2] sm:$0x1]  ;;  %s96_s28 = sshll.u32 %s163_s27, 4  ;;  %s97_s28 = int_to_ptr.vmem [resolvable:$true] %s96_s28 }
  0x14   :  { %v39_v8 = vadd.f32 %v38_v5, %v37_v4  ;;  %v49_v9 = vsel %vm36_vm0, %v47_v6, 0.0  ;;  %s136_s1 = scalar_lea.vmem %s97_s28, 256  ;;  %p141_p6 = scmp.lt.s32.totalorder %s97_s28, %s97_s28 }
  0x15   :  { %v50_v10 = vsel %vm36_vm0, %v48_v7, 0.0  ;;  %v76_v38 = vsub.s32 0, %v75_v35  ;;  %p137_p5 = scmp.ne.s32.totalorder %s97_s28, %s136_s1  ;;  %p142_p7 = scmp.lt.s32.totalorder %s136_s1, %s136_s1 }
  0x16   :  { %v40_v11 = vrot.slane %v39_v8, 4  ;;  %v51_v12 = vadd.f32 %v50_v10, %v49_v9 }
  0x17   :  { %p143_p8 = por %p142_p7, %p141_p6 }
  0x18   :  { %v41_v13 = vadd.f32 %v40_v11, %v39_v8  ;;  %v52_v14 = vrot.slane %v51_v12, 4 }
  0x19   :  { %p144_p9 = pnand %p143_p8, %p137_p5 }
  0x1a   :  { %v42_v15 = vrot.slane %v41_v13, 2  ;;  %v53_v16 = vadd.f32 %v52_v14, %v51_v12 }
  0x1c   :  { %v43_v17 = vadd.f32 %v42_v15, %v41_v13  ;;  %v54_v18 = vrot.slane %v53_v16, 2 }
  0x1e   :  { %v44_v19 = vrot.slane %v43_v17, 1  ;;  %v55_v20 = vadd.f32 %v54_v18, %v53_v16 }
  0x20   :  { %v45_v21 = vadd.f32 %v44_v19, %v43_v17  ;;  %v56_v22 = vrot.slane %v55_v20, 1 }
  0x22   :  { %v46_v23 = vmul.f32 0.0625, %v45_v21  ;;  %v57_v24 = vadd.f32 %v56_v22, %v55_v20 }
  0x24   :  { %v58_v25 = vmul.f32 0.0625, %v57_v24  ;;  %v59_v26 = vmul.f32 %v46_v23, %v46_v23 }
  0x26   :  { %v60_v27 = vsub.f32 %v58_v25, %v59_v26 }
  0x28   :  { %v61_v28 = vmax.f32 %v60_v27, 0.0 }
  0x2a   :  { %v62_v29 = vadd.f32 1e-05, %v61_v28 }
  0x2c   :  { %114 = vrsqrt.f32 %v62_v29 }
  0x39   :  { %v115_v30 = vpop.eup %114 }
  0x3a   :  { %v65_v32 = vmul.f32 %v115_v30, %v64_v31 }
  0x3c   :  { %v71_v34 = vmul.f32 %v65_v32, %v46_v23 }
  0x3e   :  { %v72_v37 = vsub.f32 %v70_v36, %v71_v34 }
  0x40   :  { %v85_v42 = vrot.slane %v72_v37, %v76_v38 }
  0x43   :  { %s109_s26 = spop %108 }
  0x44   :  { %v68_v39 = vstv %s109_s26 }
  0x45   :  { %v69_v40 = vadd.f32 %v68_v39, %v65_v32 }
  0x47   :  { %v77_v41 = vrot.slane %v69_v40, %v76_v38 }
  0x49   :  { %v79_v43 = vmul.f32 %v77_v41, %v34_v2  ;;  %v80_v44 = vmul.f32 %v77_v41, %v35_v3 }
  0x4b   :  { %v87_v45 = vadd.f32 %v85_v42, %v79_v43  ;;  %v88_v46 = vadd.f32 %v85_v42, %v80_v44 }
  0x4d   :  { %89 = vst.msk [vmem:[#allocation6] sm:$0xff] %vm36_vm0, %v87_v45  ;;  %90 = vst.msk [vmem:[#allocation6 + $0x8] sm:$0xff] %vm36_vm0, %v88_v46 }
  0x4e   :  { %147 = shalt.err (!%p144_p9)
}
  0x4f   :  { %102 = dma.vmem_to_hbm [thread:$0]  %s97_s28, 256, %s220_s4, [#allocation5], %s161_s20, %s161_s20, %s162_s21  }
  0x50   :  { %158 = dma.done.wait [#allocation5], 256  }
  0x51   :  { %159 = vsyncadd [#allocation5], 4294967040 }
  0x52   :  { %106 = vsyncpa [#allocation4], 1 }
  0x53   :  { %107 = vsyncpa [#allocation5], 1 }

</bundles_post_ra>
